<compile_context>
chip_gen: v7x
topology: tpu7x:2x2x1
jax: 0.10.0
libtpu: 0.0.40
codegen_flags: <defaults>
</compile_context>

<pallas_src>
import jax
import jax.numpy as jnp
from jax.experimental import pallas as pl
from jax.experimental.pallas import tpu as pltpu

SCALE_LB = 1e-4
SCALE_INIT = 0.5413

_MAX_LANE_TILE = 2048            # lanes per block (multiple of 128)
_TARGET_BLOCK_BYTES = 2 << 20    # ~2 MiB f32 per streamed block


def _cauchy_nll_kernel(x_ref, inv_s_ref, log_s_ref, out_ref):
    """Elementwise Cauchy NLL over one [TR, TL] tile.

    x_ref:     [TR, TL] residuals (native dtype)
    inv_s_ref: [TR, 1]  1 / scale   (f32, precomputed in wrapper)
    log_s_ref: [TR, 1]  log(scale)  (f32, precomputed in wrapper)
    out_ref:   [TR, TL] per-element NLL (x dtype)
    """
    x = x_ref[...].astype(jnp.float32)
    xs = x * inv_s_ref[...]                              # broadcast over lanes
    nll = jnp.log1p(0.5 * (xs * xs)) + log_s_ref[...]    # Cauchy NLL (alpha -> 0)
    out_ref[...] = nll.astype(out_ref.dtype)


def _round_up(a, m):
    return ((a + m - 1) // m) * m


@jax.jit
def cauchy_nll_0d(x, scale):
    """x: [b, c, h, w]; scale: [b, c, 1] (or [b, c]).  Returns [b, c, h, w] in x.dtype."""
    b, c, h, w = x.shape
    assert scale.shape[0] == b and scale.shape[1] == c
    rows, hw = b * c, h * w

    # Lane-dense 2-D view (free reshape for contiguous NCHW input; no copy, no cast).
    x2d = x.reshape(rows, hw)

    # Per-row scale path on only b*c elements (trivial), so the per-element
    # kernel does no softplus / log / divide work per tile.
    s = jax.nn.softplus(scale.astype(jnp.float32).reshape(rows, 1) + SCALE_INIT) + SCALE_LB
    inv_s = 1.0 / s
    log_s = jnp.log(s)

    # Tile selection: ~<=2 MiB blocks; lane tile multiple of 128, row tile
    # multiple of 8.  cdiv grids handle non-divisible shapes (edge tiles are
    # masked by Pallas), so arbitrary b, c, h, w work without host-side padding.
    lane_tile = min(_round_up(hw, 128), _MAX_LANE_TILE)
    max_rows = max(8, (_TARGET_BLOCK_BYTES // (lane_tile * 4)) // 8 * 8)
    row_tile = min(_round_up(rows, 8), max_rows)

    grid = (pl.cdiv(rows, row_tile), pl.cdiv(hw, lane_tile))

    out2d = pl.pallas_call(
        _cauchy_nll_kernel,
        out_shape=jax.ShapeDtypeStruct((rows, hw), x.dtype),
        grid_spec=pltpu.PrefetchScalarGridSpec(
            num_scalar_prefetch=0,
            grid=grid,
            in_specs=[
                pl.BlockSpec((row_tile, lane_tile), lambda i, j: (i, j)),
                pl.BlockSpec((row_tile, 1), lambda i, j: (i, 0)),  # const along lanes
                pl.BlockSpec((row_tile, 1), lambda i, j: (i, 0)),  # const along lanes
            ],
            out_specs=pl.BlockSpec((row_tile, lane_tile), lambda i, j: (i, j)),
        ),
        compiler_params=pltpu.CompilerParams(
            dimension_semantics=("parallel", "parallel"),
            # Double-buffered in+out blocks stay <= ~8.5 MiB; 32 MiB gives
            # headroom and fits every generation (v5e/v6e/v7x physical VMEM).
            vmem_limit_bytes=32 * 1024 * 1024,
        ),
    )(x2d, inv_s, log_s)

    return out2d.reshape(b, c, h, w)


def _reference(x, scale):
    s = jax.nn.softplus(scale.astype(jnp.float32) + SCALE_INIT) + SCALE_LB  # [b, c, 1]
    s = jnp.squeeze(s, axis=2)[:, :, None, None]                            # [b, c, 1, 1]
    xs = x.astype(jnp.float32) / s
    return jnp.log1p(0.5 * xs * xs) + jnp.log(s)


if __name__ == "__main__":
    key = jax.random.PRNGKey(0)
    kx, ks = jax.random.split(key)

    b, c, h, w = 2, 4, 16, 16
    x = jax.random.normal(kx, (b, c, h, w), dtype=jnp.float32)
    scale = jax.random.normal(ks, (b, c, 1), dtype=jnp.float32) * 0.1

    out = cauchy_nll_0d(x, scale)
    out = jax.block_until_ready(out)

    ref = _reference(x, scale)
    assert out.shape == (b, c, h, w)
    assert jnp.allclose(out.astype(jnp.float32), ref, atol=1e-5, rtol=1e-5), "mismatch vs reference"

    print("KERNEL_OK")
</pallas_src>

<mosaic_0001>
module attributes {stable_mosaic.version = 11 : i64} {
  func.func @_cauchy_nll_kernel(%arg0: i32, %arg1: i32, %arg2: memref<8x256xf32, #tpu.memory_space<vmem>>, %arg3: memref<8x1xf32, #tpu.memory_space<vmem>>, %arg4: memref<8x1xf32, #tpu.memory_space<vmem>>, %arg5: memref<8x256xf32, #tpu.memory_space<vmem>>) attributes {dimension_semantics = [#tpu.dimension_semantics<parallel>, #tpu.dimension_semantics<parallel>], iteration_bounds = array<i64: 1, 1>, scalar_prefetch = 0 : i64, scratch_operands = 0 : i64, tpu.core_type = #tpu.core_type<tc>, window_params = [{transform_indices = @transform_0, window_bounds = array<i64: 8, 256>}, {transform_indices = @transform_1, window_bounds = array<i64: 8, 1>}, {transform_indices = @transform_2, window_bounds = array<i64: 8, 1>}, {transform_indices = @transform_3, window_bounds = array<i64: 8, 256>}]} {
    %c0 = arith.constant 0 : index
    %c0_0 = arith.constant 0 : index
    %0 = vector.load %arg2[%c0, %c0_0] : memref<8x256xf32, #tpu.memory_space<vmem>>, vector<8x256xf32>
    %c0_1 = arith.constant 0 : index
    %c0_2 = arith.constant 0 : index
    %1 = vector.load %arg3[%c0_1, %c0_2] : memref<8x1xf32, #tpu.memory_space<vmem>>, vector<8x1xf32>
    %2 = vector.broadcast %1 : vector<8x1xf32> to vector<8x256xf32>
    %3 = arith.mulf %0, %2 : vector<8x256xf32>
    %4 = arith.mulf %3, %3 : vector<8x256xf32>
    %cst = arith.constant 5.000000e-01 : f32
    %5 = vector.broadcast %cst : f32 to vector<8x256xf32>
    %6 = arith.mulf %5, %4 : vector<8x256xf32>
    %7 = math.log1p %6 : vector<8x256xf32>
    %c0_3 = arith.constant 0 : index
    %c0_4 = arith.constant 0 : index
    %8 = vector.load %arg4[%c0_3, %c0_4] : memref<8x1xf32, #tpu.memory_space<vmem>>, vector<8x1xf32>
    %9 = vector.broadcast %8 : vector<8x1xf32> to vector<8x256xf32>
    %10 = arith.addf %7, %9 : vector<8x256xf32>
    %c0_5 = arith.constant 0 : index
    %c0_6 = arith.constant 0 : index
    %11 = vector.load %arg5[%c0_5, %c0_6] : memref<8x256xf32, #tpu.memory_space<vmem>>, vector<8x256xf32>
    tpu.vector_store %arg5[%c0_5, %c0_6], %10 {strides = array<i32>} : memref<8x256xf32, #tpu.memory_space<vmem>>, vector<8x256xf32>,
    return
  }
  func.func @transform_0(%arg0: i32, %arg1: i32) -> (i32, i32) {
    %c0_i32 = arith.constant 0 : i32
    return %arg0, %arg1 : i32, i32
  }
  func.func @transform_1(%arg0: i32, %arg1: i32) -> (i32, i32) {
    %c0_i32 = arith.constant 0 : i32
    %c0_i32_0 = arith.constant 0 : i32
    return %arg0, %c0_i32 : i32, i32
  }
  func.func @transform_2(%arg0: i32, %arg1: i32) -> (i32, i32) {
    %c0_i32 = arith.constant 0 : i32
    %c0_i32_0 = arith.constant 0 : i32
    return %arg0, %c0_i32 : i32, i32
  }
  func.func @transform_3(%arg0: i32, %arg1: i32) -> (i32, i32) {
    %c0_i32 = arith.constant 0 : i32
    return %arg0, %arg1 : i32, i32
  }
}

</mosaic_0001>

<bundles_post_ra>
// kernel: cauchy_nll_0d.1
= control target key start
LH: loop header
LB: loop body
LE: loop exit
PB: predicated region body
PF: predicated region fallthrough
CT: control target
= control target key end

     0   :  { %v66_v0 = vmov 0   ;;  %s105_s1 = inlined_call_operand.vmem [shape: f32[8,1], index: 1, kind: input, shape index: {}]   ;;  %s106_s2 = inlined_call_operand.vmem [shape: f32[8,1], index: 2, kind: input, shape index: {}]   ;;  %s107_s0 = inlined_call_operand.vmem [shape: f32[8,256], index: 0, kind: input, shape index: {}]   ;;  %s108_s3 = inlined_call_operand.vmem [shape: f32[8,256], index: 3, kind: output, shape index: {}]  }
   0x1   :  { %61 = vset.pattern.permute.xlu0 %v66_v0  ;;  %v16_v1 = vld [vmem:[%s105_s1] sm:$0xff]  ;;  %v15_v4 = vld [vmem:[%s107_s0 + $0x8] sm:$0xff] }
   0x2   :  { %19 = vperm.xlu0 %61, %v16_v1   ;;  %v46_v2 = vld [vmem:[%s106_s2] sm:$0xff] }
   0x3   :  { %v14_v3 = vld [vmem:[%s107_s0] sm:$0xff] }
   0x6   :  { %49 = vperm.xlu0 %61, %v46_v2  }
  0x81   :  { %v20_v5 = vpop.permute.xlu0 %19 }
  0x82   :  { %v22_v6 = vmul.f32 %v20_v5, %v14_v3  ;;  %v23_v7 = vmul.f32 %v20_v5, %v15_v4 }
  0x84   :  { %v24_v8 = vmul.f32 %v22_v6, %v22_v6  ;;  %v25_v9 = vmul.f32 %v23_v7, %v23_v7 }
  0x85   :  { %v50_v26 = vpop.permute.xlu0 %49 }
  0x86   :  { %v26_v10 = vmul.f32 0.5, %v24_v8  ;;  %v27_v11 = vmul.f32 0.5, %v25_v9 }
  0x88   :  { %v28_v12 = vadd.f32 1.0, %v26_v10  ;;  %v37_v13 = vadd.f32 1.0, %v27_v11  ;;  %v31_v14 = vmul.f32 -0.5, %v26_v10  ;;  %v40_v15 = vmul.f32 -0.5, %v27_v11 }
  0x89   :  { %v34_v17 = vand.u32 2147483647, %v26_v10  ;;  %v43_v19 = vand.u32 2147483647, %v27_v11 }
  0x8a   :  { %62 = vlog2.f32 %v28_v12  ;;  %v32_v16 = vadd.f32 1.0, %v31_v14  ;;  %v41_v18 = vadd.f32 1.0, %v40_v15 }
  0x8b   :  { %64 = vlog2.f32 %v37_v13  ;;  %vm35_vm0 = vcmp.lt.f32.partialorder %v34_v17, 0.0004427343  ;;  %vm44_vm1 = vcmp.lt.f32.partialorder %v43_v19, 0.0004427343 }
  0x8c   :  { %v33_v23 = vmul.f32 %v32_v16, %v26_v10  ;;  %v42_v25 = vmul.f32 %v41_v18, %v27_v11 }
  0x94   :  { %v63_v20 = vpop.eup %62 }
  0x95   :  { %v65_v21 = vpop.eup %64  ;;  %v30_v22 = vmul.f32 0.6931472, %v63_v20 }
  0x96   :  { %v39_v24 = vmul.f32 0.6931472, %v65_v21 }
  0x97   :  { %v36_v27 = vsel %vm35_vm0, %v33_v23, %v30_v22 }
  0x98   :  { %v45_v28 = vsel %vm44_vm1, %v42_v25, %v39_v24  ;;  %v52_v29 = vadd.f32 %v50_v26, %v36_v27 }
  0x99   :  { %v53_v30 = vadd.f32 %v50_v26, %v45_v28 }
  0x9a   :  { %54 = vst [vmem:[%s108_s3] sm:$0xff] %v52_v29 }
  0x9b   :  { %55 = vst [vmem:[%s108_s3 + $0x8] sm:$0xff] %v53_v30 }

</bundles_post_ra>
